<compile_context>
chip_gen: v7x
topology: tpu7x:2x2x1
jax: 0.10.0
libtpu: 0.0.40
codegen_flags: <defaults>
</compile_context>

<pallas_src>
import functools

import jax
import jax.numpy as jnp
from jax.experimental import pallas as pl
from jax.experimental.pallas import tpu as pltpu


def _round_up(x, m):
    return ((x + m - 1) // m) * m


def _meanfield_kernel(params_ref, eps_ref, z_ref):
    # params_ref : (2, D) resident VMEM block; row 0 = mu, row 1 = std
    # eps_ref    : (TB, D) input noise block
    # z_ref      : (TB, D) output block
    mu = params_ref[0:1, :]                      # (1, D)
    std = params_ref[1:2, :]                     # (1, D)
    z_ref[...] = mu + std * eps_ref[...]         # VPU FMA, (1,D)->(TB,D) broadcast


@functools.partial(jax.jit, static_argnames=("b", "target_block_bytes", "vmem_limit_bytes"))
def _mean_field_forward_impl(mu, logvar, key, b, target_block_bytes, vmem_limit_bytes):
    D = mu.shape[0]

    # ---- batch tiling: compute grid first, then tile size (bounds padding) ----
    b8 = _round_up(max(b, 1), 8)
    row_bytes = D * 4
    rows_budget = max(8, (target_block_bytes // row_bytes) // 8 * 8)
    grid = pl.cdiv(b8, rows_budget)
    if grid == 1 and b8 >= 16:
        grid = 2                                  # keep both TCs busy on v7x / megacore
    tile_b = _round_up(pl.cdiv(b8, grid), 8)
    Bp = grid * tile_b                            # padded rows bounded by ~8*grid

    # ---- VMEM budget guard: (eps + z) blocks, double-buffered, + params ----
    block_bytes = tile_b * row_bytes
    need = 4 * block_bytes + 2 * row_bytes
    assert need <= vmem_limit_bytes, (
        f"MeanField kernel VMEM budget exceeded ({need} > {vmem_limit_bytes} bytes); "
        f"reduce target_block_bytes or add a feature-dim grid axis for very large D."
    )

    std = jnp.exp(0.5 * logvar.astype(jnp.float32))
    params = jnp.stack([mu.astype(jnp.float32), std], axis=0)       # (2, D), resident

    # eps ~ N(0,1) at the (slightly) padded batch size so blocks divide evenly.
    eps = jax.random.normal(key, (Bp, D), dtype=jnp.float32)

    z_full = pl.pallas_call(
        _meanfield_kernel,
        out_shape=jax.ShapeDtypeStruct((Bp, D), jnp.float32),
        grid=(grid,),
        in_specs=[
            pl.BlockSpec((2, D), lambda i: (0, 0)),        # mu+std, resident block
            pl.BlockSpec((tile_b, D), lambda i: (i, 0)),   # eps tile
        ],
        out_specs=pl.BlockSpec((tile_b, D), lambda i: (i, 0)),
        compiler_params=pltpu.CompilerParams(
            dimension_semantics=("parallel",),             # megacore / v7x 2-TC sharding
            vmem_limit_bytes=vmem_limit_bytes,
        ),
    )(params, eps)

    z = z_full if Bp == b else z_full[:b, :]
    return z, mu, logvar


def mean_field_forward(mu, logvar, key, b, *,
                       target_block_bytes=8 * 1024 * 1024,
                       vmem_limit_bytes=48 * 1024 * 1024):
    """MeanField.forward(b): z = mu + exp(0.5*logvar) * eps, eps ~ N(0,1).

    mu, logvar : (D,) float32 parameters
    key        : jax PRNG key for eps (replaces torch.randn's global stream)
    b          : batch size (static)
    returns    : (z (b, D) float32, mu (D,), logvar (D,))
    """
    return _mean_field_forward_impl(mu, logvar, key, int(b),
                                    target_block_bytes, vmem_limit_bytes)


if __name__ == "__main__":
    D = 256   # feature dim (multiple of 128 -> lane-dense stores)
    B = 8     # batch size passed to forward(b)

    root = jax.random.PRNGKey(0)
    k_mu, k_lv, k_eps = jax.random.split(root, 3)

    # Deterministic parameter init (matches nn.init.normal_: N(0,1)).
    mu = jax.random.normal(k_mu, (D,), dtype=jnp.float32)
    logvar = jax.random.normal(k_lv, (D,), dtype=jnp.float32)

    z, mu_out, logvar_out = mean_field_forward(mu, logvar, k_eps, B)
    z = jax.block_until_ready(z)

    # --- correctness checks ---
    assert z.shape == (B, D)
    assert mu_out.shape == (D,) and logvar_out.shape == (D,)
    assert bool(jnp.all(jnp.isfinite(z)))

    # Exact reference: same key + shape -> same eps as inside the wrapper.
    eps_ref = jax.random.normal(k_eps, (B, D), dtype=jnp.float32)
    z_ref = mu[None, :] + jnp.exp(0.5 * logvar)[None, :] * eps_ref
    assert bool(jnp.allclose(z, z_ref, rtol=1e-5, atol=1e-5))

    # Deterministic given the key.
    z2, _, _ = mean_field_forward(mu, logvar, k_eps, B)
    assert bool(jnp.all(z == jax.block_until_ready(z2)))

    # Statistical sanity of the recovered noise (~N(0,1)).
    eps_hat = (z - mu[None, :]) / jnp.exp(0.5 * logvar)[None, :]
    assert abs(float(eps_hat.mean())) < 0.2
    assert abs(float(eps_hat.std()) - 1.0) < 0.2

    print("KERNEL_OK")
</pallas_src>

<mosaic_0001>
module attributes {stable_mosaic.version = 11 : i64} {
  func.func @_meanfield_kernel(%arg0: i32, %arg1: memref<2x256xf32, #tpu.memory_space<vmem>>, %arg2: memref<8x256xf32, #tpu.memory_space<vmem>>, %arg3: memref<8x256xf32, #tpu.memory_space<vmem>>) attributes {dimension_semantics = [#tpu.dimension_semantics<parallel>], iteration_bounds = array<i64: 1>, scalar_prefetch = 0 : i64, scratch_operands = 0 : i64, tpu.core_type = #tpu.core_type<tc>, window_params = [{pipeline_mode = #tpu.pipeline_mode<synchronous>, transform_indices = @transform_0, window_bounds = array<i64: 2, 256>}, {transform_indices = @transform_1, window_bounds = array<i64: 8, 256>}, {transform_indices = @transform_2, window_bounds = array<i64: 8, 256>}]} {
    %c0 = arith.constant 0 : index
    %c0_0 = arith.constant 0 : index
    %0 = vector.load %arg1[%c0, %c0_0] : memref<2x256xf32, #tpu.memory_space<vmem>>, vector<1x256xf32>
    %c1 = arith.constant 1 : index
    %c0_1 = arith.constant 0 : index
    %1 = vector.load %arg1[%c1, %c0_1] : memref<2x256xf32, #tpu.memory_space<vmem>>, vector<1x256xf32>
    %c0_2 = arith.constant 0 : index
    %c0_3 = arith.constant 0 : index
    %2 = vector.load %arg2[%c0_2, %c0_3] : memref<8x256xf32, #tpu.memory_space<vmem>>, vector<8x256xf32>
    %3 = vector.broadcast %1 : vector<1x256xf32> to vector<8x256xf32>
    %4 = arith.mulf %3, %2 : vector<8x256xf32>
    %5 = vector.broadcast %0 : vector<1x256xf32> to vector<8x256xf32>
    %6 = arith.addf %5, %4 : vector<8x256xf32>
    %c0_4 = arith.constant 0 : index
    %c0_5 = arith.constant 0 : index
    %7 = vector.load %arg3[%c0_4, %c0_5] : memref<8x256xf32, #tpu.memory_space<vmem>>, vector<8x256xf32>
    tpu.vector_store %arg3[%c0_4, %c0_5], %6 {strides = array<i32>} : memref<8x256xf32, #tpu.memory_space<vmem>>, vector<8x256xf32>,
    return
  }
  func.func @transform_0(%arg0: i32) -> (i32, i32) {
    %c0_i32 = arith.constant 0 : i32
    %c0_i32_0 = arith.constant 0 : i32
    %c0_i32_1 = arith.constant 0 : i32
    return %c0_i32, %c0_i32_0 : i32, i32
  }
  func.func @transform_1(%arg0: i32) -> (i32, i32) {
    %c0_i32 = arith.constant 0 : i32
    %c0_i32_0 = arith.constant 0 : i32
    return %arg0, %c0_i32 : i32, i32
  }
  func.func @transform_2(%arg0: i32) -> (i32, i32) {
    %c0_i32 = arith.constant 0 : i32
    %c0_i32_0 = arith.constant 0 : i32
    return %arg0, %c0_i32 : i32, i32
  }
}

</mosaic_0001>

<bundles_post_ra>
// kernel: _mean_field_forward_impl.1
= control target key start
LH: loop header
LB: loop body
LE: loop exit
PB: predicated region body
PF: predicated region fallthrough
CT: control target
= control target key end

     0   :  { %v18_v0 = vlaneseq  ;;  %s125_s0 = inlined_call_operand.vmem [shape: f32[2,256], index: 0, kind: input, shape index: {}]   ;;  %s126_s1 = inlined_call_operand.vmem [shape: f32[8,256], index: 1, kind: input, shape index: {}]   ;;  %s127_s2 = inlined_call_operand.hbm [shape: f32[8,256], index: 2, kind: output, shape index: {}]  }
   0x1   :  { %7 = vsyncpa [#allocation3], 0  ;;  %v12_v2 = vld [vmem:[%s125_s0] ss:$2 sm:$0x3]  ;;  %v16_v7 = vld [vmem:[%s126_s1 + $0x8] sm:$0xff] }
   0x2   :  { %v19_v1 = vshrl.u32 %v18_v0, 7  ;;  %v59_v3 = vld [vmem:[%s125_s0 + $0x1] ss:$2 sm:$0x3]  ;;  %s85_s17 = smov [#allocation2]  }
   0x3   :  { %v15_v6 = vld [vmem:[%s126_s1] sm:$0xff]  ;;  %s51_s18 = sshll.u32 %s85_s17, 4  ;;  %s52_s18 = int_to_ptr.vmem [resolvable:$true] %s51_s18 }
   0x4   :  { %v20_v4 = vsub.s32 0, %v19_v1  ;;  %v24_v5 = vsub.s32 1, %v19_v1  ;;  %s61_s0 = scalar_lea.vmem %s52_s18, 256  ;;  %p66_p1 = scmp.lt.s32.totalorder %s52_s18, %s52_s18 }
   0x5   :  { %p62_p0 = scmp.ne.s32.totalorder %s52_s18, %s61_s0  ;;  %p67_p2 = scmp.lt.s32.totalorder %s61_s0, %s61_s0 }
   0x6   :  { %v21_v8 = vrot.slane %v59_v3, %v20_v4  ;;  %v34_v9 = vrot.slane %v12_v2, %v20_v4  ;;  %v25_v10 = vrot.slane %v59_v3, %v24_v5  ;;  %v38_v11 = vrot.slane %v12_v2, %v24_v5 }
   0x7   :  { %p68_p3 = por %p67_p2, %p66_p1 }
   0x8   :  { %v28_v12 = vmul.f32 %v21_v8, %v15_v6  ;;  %v29_v13 = vmul.f32 %v25_v10, %v16_v7 }
   0x9   :  { %p69_p4 = pnand %p68_p3, %p62_p0 }
   0xa   :  { %v41_v14 = vadd.f32 %v34_v9, %v28_v12  ;;  %v42_v15 = vadd.f32 %v38_v11, %v29_v13 }
   0xc   :  { %43 = vst [vmem:[#allocation2] sm:$0xff] %v41_v14  ;;  %44 = vst [vmem:[#allocation2 + $0x8] sm:$0xff] %v42_v15 }
   0xd   :  { %72 = shalt.err (!%p69_p4)
}
   0xe   :  { %s73_s20 = scalar_lea.hbm %s127_s2, 256 }
   0xf   :  { %p74_p5 = scmp.ne.s32.totalorder %s127_s2, %s73_s20  ;;  %p77_p6 = scmp.lt.u32.totalorder %s73_s20, %s127_s2 }
  0x11   :  { %p79_p7 = pnand %p77_p6, %p74_p5 }
  0x13   :  { %82 = shalt.err (!%p79_p7)
}
  0x14   :  { %54 = dma.vmem_to_hbm [thread:$0]  %s52_s18, 256, %s127_s2, [#allocation3]  }
  0x15   :  { %83 = dma.done.wait [#allocation3], 256  }
  0x16   :  { %84 = vsyncadd [#allocation3], 4294967040 }
  0x17   :  { %58 = vsyncpa [#allocation3], 1 }

</bundles_post_ra>
